<compile_context>
chip_gen: v7x
topology: tpu7x:2x2x1
jax: 0.10.0
libtpu: 0.0.40
codegen_flags: <defaults>
</compile_context>

<pallas_src>
import math
import functools

import jax
import jax.numpy as jnp
from jax import lax
from jax.experimental import pallas as pl
from jax.experimental.pallas import tpu as pltpu


def _pick_tile(dim, pref):
    """Biggest MXU-friendly tile: `pref` if it is a 128-multiple dividing `dim`,
    otherwise fall back to the full dimension (always a legal block shape)."""
    pref = min(pref, dim)
    if pref % 128 == 0 and dim % pref == 0:
        return pref
    return dim


# ---------------------------------------------------------------------------
# Projection kernel:  y = x @ W.T   with W in PyTorch (out_features, in) layout.
# K-tiled with an fp32 VMEM accumulator; contraction on W's last dim so no
# transposed weight copy is ever created.
# ---------------------------------------------------------------------------
def _linear_kernel(x_ref, w_ref, o_ref, acc_ref):
    @pl.when(pl.program_id(2) == 0)
    def _():
        acc_ref[...] = jnp.zeros(acc_ref.shape, acc_ref.dtype)

    acc_ref[...] += lax.dot_general(
        x_ref[...], w_ref[...],
        dimension_numbers=(((1,), (1,)), ((), ())),   # contract both last dims
        preferred_element_type=jnp.float32)

    @pl.when(pl.program_id(2) == pl.num_programs(2) - 1)
    def _():
        o_ref[...] = acc_ref[...].astype(o_ref.dtype)


def pallas_linear(x, w, *, out_dtype=None, tm=256, tn=256, tk=512):
    """x: (M, K); w: (N, K) (PyTorch Linear weight); returns x @ w.T : (M, N)."""
    M, K = x.shape
    N, K2 = w.shape
    assert K == K2
    out_dtype = x.dtype if out_dtype is None else out_dtype
    tm = _pick_tile(M, tm)
    tn = _pick_tile(N, tn)
    tk = _pick_tile(K, tk)
    grid = (M // tm, N // tn, K // tk)

    cost = pl.CostEstimate(
        flops=int(2 * M * N * K),
        transcendentals=0,
        bytes_accessed=int((M * K + N * K + M * N) * x.dtype.itemsize))

    return pl.pallas_call(
        _linear_kernel,
        out_shape=jax.ShapeDtypeStruct((M, N), out_dtype),
        grid_spec=pltpu.PrefetchScalarGridSpec(
            num_scalar_prefetch=0,
            grid=grid,
            in_specs=[
                pl.BlockSpec((tm, tk), lambda i, j, k: (i, k)),
                pl.BlockSpec((tn, tk), lambda i, j, k: (j, k)),
            ],
            out_specs=pl.BlockSpec((tm, tn), lambda i, j, k: (i, j)),
            scratch_shapes=[pltpu.VMEM((tm, tn), jnp.float32)]),
        compiler_params=pltpu.CompilerParams(
            dimension_semantics=("parallel", "parallel", "arbitrary")),
        cost_estimate=cost,
    )(x, w)


# ---------------------------------------------------------------------------
# GQA attention kernel (flash-style, head-batched, mean over KV heads).
#   q: (B, G, Lq, D)   k, v: (B, H, Lk, D)   out: (B, G, Lq, D)
# grid = (B, G, Lq//TQ, Lk//TK); Lk innermost ("arbitrary") with online softmax.
# ---------------------------------------------------------------------------
def _gqa_attention_kernel(q_ref, k_ref, v_ref, o_ref, m_ref, l_ref, acc_ref,
                          *, scale):
    ki = pl.program_id(3)

    @pl.when(ki == 0)
    def _():
        m_ref[...] = jnp.full(m_ref.shape, -jnp.inf, jnp.float32)
        l_ref[...] = jnp.zeros(l_ref.shape, jnp.float32)
        acc_ref[...] = jnp.zeros(acc_ref.shape, jnp.float32)

    H = k_ref.shape[1]
    q = q_ref[0, 0] * scale              # (TQ, D); scale folded into Q once
    k = k_ref[0]                         # (H, TK, D)
    v = v_ref[0]                         # (H, TK, D)

    # Head-batched scores for all H KV heads in one batched contraction:
    # no k.T, no per-head lane slicing.
    qb = jnp.broadcast_to(q[None], (H,) + q.shape)                    # (H, TQ, D)
    s = jnp.einsum('hqd,hkd->hqk', qb, k,
                   preferred_element_type=jnp.float32)                # (H, TQ, TK)

    # Per-head online softmax state.
    m_prev = m_ref[...]                                               # (H, TQ, 1)
    m_new = jnp.maximum(m_prev, jnp.max(s, axis=-1, keepdims=True))
    alpha = jnp.exp(m_prev - m_new)
    p = jnp.exp(s - m_new)                                            # (H, TQ, TK)
    l_ref[...] = alpha * l_ref[...] + jnp.sum(p, axis=-1, keepdims=True)
    acc_ref[...] = alpha * acc_ref[...] + jnp.einsum(
        'hqk,hkd->hqd', p.astype(v.dtype), v,
        preferred_element_type=jnp.float32)                           # (H, TQ, D)
    m_ref[...] = m_new

    # TODO(synk): optional attention `mask` not implemented (mask=None path).
    @pl.when(ki == pl.num_programs(3) - 1)
    def _():
        # Softmax denominator and the 1/H mean over heads folded into one
        # approximate reciprocal (EUP slot).
        inv = pl.reciprocal(l_ref[...] * float(H), approx=True)       # (H, TQ, 1)
        o_ref[0, 0] = jnp.sum(acc_ref[...] * inv, axis=0).astype(o_ref.dtype)


def gqa_attention(q, k, v, *, q_tile=256, kv_tile=512):
    """Tile guidance: v5e -> 128-aligned q/kv tiles; v6e/v7x -> 256-aligned;
    on v7x re-derive against the 64 MiB VMEM budget (set vmem_limit_bytes)."""
    B, G, Lq, D = q.shape
    _, H, Lk, _ = k.shape
    TQ = _pick_tile(Lq, q_tile)
    TK = _pick_tile(Lk, kv_tile)
    grid = (B, G, Lq // TQ, Lk // TK)
    scale = 1.0 / math.sqrt(D)

    cost = pl.CostEstimate(
        flops=int(4 * B * G * H * Lq * Lk * D),
        transcendentals=int(B * G * H * Lq * Lk),
        bytes_accessed=int((2 * q.size + G * (Lq // TQ) * (k.size + v.size))
                           * q.dtype.itemsize))

    kernel = functools.partial(_gqa_attention_kernel, scale=scale)

    return pl.pallas_call(
        kernel,
        out_shape=jax.ShapeDtypeStruct((B, G, Lq, D), q.dtype),
        grid_spec=pltpu.PrefetchScalarGridSpec(
            num_scalar_prefetch=0,
            grid=grid,
            in_specs=[
                pl.BlockSpec((1, 1, TQ, D), lambda b, g, qi, ki: (b, g, qi, 0)),
                pl.BlockSpec((1, H, TK, D), lambda b, g, qi, ki: (b, 0, ki, 0)),
                pl.BlockSpec((1, H, TK, D), lambda b, g, qi, ki: (b, 0, ki, 0)),
            ],
            out_specs=pl.BlockSpec((1, 1, TQ, D), lambda b, g, qi, ki: (b, g, qi, 0)),
            scratch_shapes=[
                pltpu.VMEM((H, TQ, 1), jnp.float32),    # running max  m
                pltpu.VMEM((H, TQ, 1), jnp.float32),    # running sum  l
                pltpu.VMEM((H, TQ, D), jnp.float32),    # running accumulator
            ]),
        compiler_params=pltpu.CompilerParams(
            dimension_semantics=("parallel", "parallel", "parallel", "arbitrary")),
        cost_estimate=cost,
    )(q, k, v)


# ---------------------------------------------------------------------------
# Full forward (projections + attention + output projection).
# ---------------------------------------------------------------------------
def group_query_attention(x_q, x_k, x_v, wq, wk, wv, wo, *,
                          num_heads_kv, num_groups_q,
                          compute_dtype=None, q_tile=256, kv_tile=512):
    B, Lq, dm = x_q.shape
    _, Lk, _ = x_k.shape
    assert dm % num_heads_kv == 0 and dm % num_groups_q == 0
    depth_kv = dm // num_heads_kv
    depth_q = dm // num_groups_q
    # The reference torch.matmul requires matching depths.
    assert depth_q == depth_kv, "reference semantics require depth_q == depth_kv"
    D = depth_q

    cdt = x_q.dtype if compute_dtype is None else compute_dtype
    xq2 = x_q.reshape(B * Lq, dm).astype(cdt)
    xk2 = x_k.reshape(B * Lk, dm).astype(cdt)
    xv2 = x_v.reshape(B * Lk, dm).astype(cdt)
    wq_c, wk_c, wv_c, wo_c = (w.astype(cdt) for w in (wq, wk, wv, wo))

    # Input projections (fp32 accumulation inside the kernel).
    q = pallas_linear(xq2, wq_c, out_dtype=cdt)
    k = pallas_linear(xk2, wk_c, out_dtype=cdt)
    v = pallas_linear(xv2, wv_c, out_dtype=cdt)

    # Head-major layout plumbing (cheap XLA reshapes, outside the kernels).
    q = q.reshape(B, Lq, num_groups_q, D).transpose(0, 2, 1, 3)    # (B, G, Lq, D)
    k = k.reshape(B, Lk, num_heads_kv, D).transpose(0, 2, 1, 3)    # (B, H, Lk, D)
    v = v.reshape(B, Lk, num_heads_kv, D).transpose(0, 2, 1, 3)

    attn = gqa_attention(q, k, v, q_tile=q_tile, kv_tile=kv_tile)  # (B, G, Lq, D)

    combined = attn.transpose(0, 2, 1, 3).reshape(B * Lq, num_groups_q * D)
    out = pallas_linear(combined, wo_c, out_dtype=x_q.dtype)
    return out.reshape(B, Lq, dm)


# ---------------------------------------------------------------------------
# Pure-JAX reference (mirrors the PyTorch forward, mask=None, eval mode).
# ---------------------------------------------------------------------------
def gqa_reference(x_q, x_k, x_v, wq, wk, wv, wo, *, num_heads_kv, num_groups_q):
    B, Lq, dm = x_q.shape
    _, Lk, _ = x_k.shape
    depth_kv = dm // num_heads_kv
    depth_q = dm // num_groups_q
    q = (x_q @ wq.T).reshape(B, Lq, num_groups_q, depth_q).transpose(0, 2, 1, 3)
    k = (x_k @ wk.T).reshape(B, Lk, num_heads_kv, depth_kv).transpose(0, 2, 1, 3)
    v = (x_v @ wv.T).reshape(B, Lk, num_heads_kv, depth_kv).transpose(0, 2, 1, 3)
    scale = 1.0 / math.sqrt(depth_q)
    outs = []
    for g in range(num_groups_q):
        scores = jnp.einsum('bqd,bhkd->bhqk', q[:, g], k) * scale   # (B,H,Lq,Lk)
        w = jax.nn.softmax(scores, axis=-1)
        attn = jnp.einsum('bhqk,bhkd->bhqd', w, v)                  # (B,H,Lq,D)
        outs.append(jnp.mean(attn, axis=1, keepdims=True))          # (B,1,Lq,D)
    combined = jnp.concatenate(outs, axis=1)                        # (B,G,Lq,D)
    combined = jnp.transpose(combined, (0, 2, 1, 3)).reshape(
        B, Lq, num_groups_q * depth_q)
    return combined @ wo.T


if __name__ == "__main__":
    # Small config consistent with the module's constraints.
    B, Lq, Lk = 2, 8, 16
    d_model = 32
    num_heads_kv = 4
    num_groups_q = 4   # depth_q == depth_kv required by the reference matmul

    key = jax.random.PRNGKey(0)
    k_xq, k_xk, k_xv, k_wq, k_wk, k_wv, k_wo = jax.random.split(key, 7)

    x_q = jax.random.normal(k_xq, (B, Lq, d_model), dtype=jnp.float32)
    x_k = jax.random.normal(k_xk, (B, Lk, d_model), dtype=jnp.float32)
    x_v = jax.random.normal(k_xv, (B, Lk, d_model), dtype=jnp.float32)

    w_scale = 1.0 / math.sqrt(d_model)
    wq = jax.random.uniform(k_wq, (d_model, d_model), jnp.float32, -w_scale, w_scale)
    wk = jax.random.uniform(k_wk, (d_model, d_model), jnp.float32, -w_scale, w_scale)
    wv = jax.random.uniform(k_wv, (d_model, d_model), jnp.float32, -w_scale, w_scale)
    wo = jax.random.uniform(k_wo, (d_model, d_model), jnp.float32, -w_scale, w_scale)

    ref = gqa_reference(x_q, x_k, x_v, wq, wk, wv, wo,
                        num_heads_kv=num_heads_kv, num_groups_q=num_groups_q)

    # fp32 path.
    out = group_query_attention(x_q, x_k, x_v, wq, wk, wv, wo,
                                num_heads_kv=num_heads_kv,
                                num_groups_q=num_groups_q)
    out = jax.block_until_ready(out)
    assert out.shape == (B, Lq, d_model)
    assert jnp.allclose(out, ref, atol=2e-2, rtol=2e-2), (
        "fp32 mismatch vs reference: max abs err = "
        + str(jnp.max(jnp.abs(out - ref))))

    # bf16 MXU-input path (production configuration); looser tolerance.
    out_bf16 = group_query_attention(x_q, x_k, x_v, wq, wk, wv, wo,
                                     num_heads_kv=num_heads_kv,
                                     num_groups_q=num_groups_q,
                                     compute_dtype=jnp.bfloat16)
    out_bf16 = jax.block_until_ready(out_bf16).astype(jnp.float32)
    assert jnp.allclose(out_bf16, ref, atol=8e-2, rtol=8e-2), (
        "bf16 mismatch vs reference: max abs err = "
        + str(jnp.max(jnp.abs(out_bf16 - ref))))

    print("KERNEL_OK")
</pallas_src>

<mosaic_0001>
module attributes {stable_mosaic.version = 11 : i64} {
  func.func @_linear_kernel(%arg0: i32, %arg1: i32, %arg2: i32, %arg3: memref<16x32xf32, #tpu.memory_space<vmem>>, %arg4: memref<32x32xf32, #tpu.memory_space<vmem>>, %arg5: memref<16x32xf32, #tpu.memory_space<vmem>>, %arg6: memref<16x32xf32, #tpu.memory_space<vmem>>) attributes {dimension_semantics = [#tpu.dimension_semantics<parallel>, #tpu.dimension_semantics<parallel>, #tpu.dimension_semantics<arbitrary>], iteration_bounds = array<i64: 1, 1, 1>, scalar_prefetch = 0 : i64, scratch_operands = 1 : i64, tpu.core_type = #tpu.core_type<tc>, window_params = [{transform_indices = @transform_0, window_bounds = array<i64: 16, 32>}, {transform_indices = @transform_1, window_bounds = array<i64: 32, 32>}, {transform_indices = @transform_2, window_bounds = array<i64: 16, 32>}]} {
    %c0_i32 = arith.constant 0 : i32
    %0 = arith.cmpi eq, %arg2, %c0_i32 : i32
    %1 = arith.extui %0 : i1 to i32
    %c0_i32_0 = arith.constant 0 : i32
    %2 = arith.cmpi ne, %1, %c0_i32_0 : i32
    scf.if %2 {
      %cst_10 = arith.constant 0.000000e+00 : f32
      %12 = vector.broadcast %cst_10 : f32 to vector<16x32xf32>
      %c0_11 = arith.constant 0 : index
      %c0_12 = arith.constant 0 : index
      %13 = vector.load %arg6[%c0_11, %c0_12] : memref<16x32xf32, #tpu.memory_space<vmem>>, vector<16x32xf32>
      tpu.vector_store %arg6[%c0_11, %c0_12], %12 {strides = array<i32>} : memref<16x32xf32, #tpu.memory_space<vmem>>, vector<16x32xf32>,
    } else {
    }
    %c0 = arith.constant 0 : index
    %c0_1 = arith.constant 0 : index
    %3 = vector.load %arg6[%c0, %c0_1] : memref<16x32xf32, #tpu.memory_space<vmem>>, vector<16x32xf32>
    %c0_2 = arith.constant 0 : index
    %c0_3 = arith.constant 0 : index
    %4 = vector.load %arg3[%c0_2, %c0_3] : memref<16x32xf32, #tpu.memory_space<vmem>>, vector<16x32xf32>
    %c0_4 = arith.constant 0 : index
    %c0_5 = arith.constant 0 : index
    %5 = vector.load %arg4[%c0_4, %c0_5] : memref<32x32xf32, #tpu.memory_space<vmem>>, vector<32x32xf32>
    %cst = arith.constant dense<0.000000e+00> : vector<16x32xf32>
    %6 = tpu.matmul %4, %5, %cst {dimension_numbers = #tpu.dot_dimension_numbers<[1], [1], [0], [0], [0, 0, 1, 0], [], []>} : vector<16x32xf32>, vector<32x32xf32>, vector<16x32xf32> -> vector<16x32xf32>
    %7 = arith.addf %3, %6 : vector<16x32xf32>
    %c0_6 = arith.constant 0 : index
    %c0_7 = arith.constant 0 : index
    %8 = vector.load %arg6[%c0_6, %c0_7] : memref<16x32xf32, #tpu.memory_space<vmem>>, vector<16x32xf32>
    tpu.vector_store %arg6[%c0_6, %c0_7], %7 {strides = array<i32>} : memref<16x32xf32, #tpu.memory_space<vmem>>, vector<16x32xf32>,
    %c0_i32_8 = arith.constant 0 : i32
    %9 = arith.cmpi eq, %arg2, %c0_i32_8 : i32
    %10 = arith.extui %9 : i1 to i32
    %c0_i32_9 = arith.constant 0 : i32
    %11 = arith.cmpi ne, %10, %c0_i32_9 : i32
    scf.if %11 {
      %c0_10 = arith.constant 0 : index
      %c0_11 = arith.constant 0 : index
      %12 = vector.load %arg6[%c0_10, %c0_11] : memref<16x32xf32, #tpu.memory_space<vmem>>, vector<16x32xf32>
      %c0_12 = arith.constant 0 : index
      %c0_13 = arith.constant 0 : index
      %13 = vector.load %arg5[%c0_12, %c0_13] : memref<16x32xf32, #tpu.memory_space<vmem>>, vector<16x32xf32>
      tpu.vector_store %arg5[%c0_12, %c0_13], %12 {strides = array<i32>} : memref<16x32xf32, #tpu.memory_space<vmem>>, vector<16x32xf32>,
    } else {
    }
    return
  }
  func.func @transform_0(%arg0: i32, %arg1: i32, %arg2: i32) -> (i32, i32) {
    %c0_i32 = arith.constant 0 : i32
    return %arg0, %arg2 : i32, i32
  }
  func.func @transform_1(%arg0: i32, %arg1: i32, %arg2: i32) -> (i32, i32) {
    %c0_i32 = arith.constant 0 : i32
    return %arg1, %arg2 : i32, i32
  }
  func.func @transform_2(%arg0: i32, %arg1: i32, %arg2: i32) -> (i32, i32) {
    %c0_i32 = arith.constant 0 : i32
    return %arg0, %arg1 : i32, i32
  }
}

</mosaic_0001>

<bundles_post_ra>
// kernel: tpu_custom_call.1
= control target key start
LH: loop header
LB: loop body
LE: loop exit
PB: predicated region body
PF: predicated region fallthrough
CT: control target
= control target key end

     0   :  { %7 = vsyncpa [#allocation4], 0  ;;  %s367_s0 = inlined_call_operand.hbm [shape: f32[16,32], index: 0, kind: input, shape index: {}]   ;;  %s368_s1 = inlined_call_operand.hbm [shape: f32[32,32], index: 1, kind: input, shape index: {}]   ;;  %s369_s2 = inlined_call_operand.hbm [shape: f32[16,32], index: 2, kind: output, shape index: {}]  }
   0x1   :  { %8 = vsyncpa [#allocation7], 0 }
   0x2   :  { %9 = vsyncpa [#allocation5], 0  ;;  %s291_s9 = smov [#allocation3]   ;;  %s219_s13 = scalar_lea.hbm %s367_s0, 256 }
   0x3   :  { %s15_s10 = sshll.u32 %s291_s9, 4  ;;  %p220_p0 = scmp.ne.s32.totalorder %s367_s0, %s219_s13  ;;  %s16_s10 = int_to_ptr.vmem [resolvable:$true] %s15_s10 }
   0x4   :  { %p223_p1 = scmp.lt.u32.totalorder %s219_s13, %s367_s0 }
   0x6   :  { %p225_p2 = pnand %p223_p1, %p220_p0 }
   0x8   :  { %228 = shalt.err (!%p225_p2)
}
   0x9   :  { %s229_s18 = scalar_lea.vmem %s16_s10, 256  ;;  %p234_p4 = scmp.lt.s32.totalorder %s16_s10, %s16_s10 }
   0xa   :  { %p230_p3 = scmp.ne.s32.totalorder %s16_s10, %s229_s18  ;;  %p235_p5 = scmp.lt.s32.totalorder %s229_s18, %s229_s18 }
   0xc   :  { %p236_p6 = por %p235_p5, %p234_p4 }
   0xe   :  { %p237_p7 = pnand %p236_p6, %p230_p3 }
  0x10   :  { %240 = shalt.err (!%p237_p7)
}
  0x11   :  { %s292_s19 = smov 128   ;;  %s293_s20 = smov 8  }
  0x12   :  { %21 = dma.hbm_to_vmem [thread:$0]  %s367_s0, 256, %s16_s10, [#allocation4], %s292_s19, %s292_s19, %s293_s20  }
  0x13   :  { %s294_s23 = smov [#allocation6]   ;;  %s241_s27 = scalar_lea.hbm %s368_s1, 512 }
  0x14   :  { %s27_s24 = sshll.u32 %s294_s23, 4  ;;  %p242_p8 = scmp.ne.s32.totalorder %s368_s1, %s241_s27  ;;  %s28_s24 = int_to_ptr.vmem [resolvable:$true] %s27_s24 }
  0x15   :  { %p245_p9 = scmp.lt.u32.totalorder %s241_s27, %s368_s1 }
  0x17   :  { %p247_p10 = pnand %p245_p9, %p242_p8 }
  0x19   :  { %250 = shalt.err (!%p247_p10)
}
  0x1a   :  { %s251_s4 = scalar_lea.vmem %s28_s24, 512  ;;  %p256_p12 = scmp.lt.s32.totalorder %s28_s24, %s28_s24 }
  0x1b   :  { %p252_p11 = scmp.ne.s32.totalorder %s28_s24, %s251_s4  ;;  %p257_p13 = scmp.lt.s32.totalorder %s251_s4, %s251_s4 }
  0x1d   :  { %p258_p0 = por %p257_p13, %p256_p12 }
  0x1f   :  { %p259_p1 = pnand %p258_p0, %p252_p11 }
  0x21   :  { %262 = shalt.err (!%p259_p1)
}
  0x22   :  { %33 = dma.hbm_to_vmem [thread:$0]  %s368_s1, 512, %s28_s24, [#allocation7], %s292_s19, %s292_s19, %s293_s20  }
  0x23   :  { %285 = dma.done.wait [#allocation4], 256  }
  0x24   :  { %286 = vsyncadd [#allocation4], 4294967040 }
  0x25   :  { %287 = dma.done.wait [#allocation7], 512  }
  0x26   :  { %288 = vsyncadd [#allocation7], 4294966784  ;;  %vm44_vm0 = vcmask 261120   ;;  %v295_v0 = vmov 0.0   ;;  %v51_v1 = vld [vmem:[#allocation6] sm:$0xff]  ;;  %v52_v2 = vld [vmem:[#allocation6 + $0x8] sm:$0xff] }
  0x27   :  { %46 = vst.msk [vmem:[#allocation2 + $0x8] sm:$0xff] %vm44_vm0, %v295_v0  ;;  %45 = vst.msk [vmem:[#allocation2] sm:$0xff] %vm44_vm0, %v295_v0  ;;  %v53_v3 = vld [vmem:[#allocation6 + $0x10] sm:$0xff]  ;;  %v201_v4 = vpack.c.bf16 %v52_v2, %v51_v1  ;;  %v54_v5 = vld [vmem:[#allocation6 + $0x18] sm:$0xff]  ;;  %s296_s1 = smov [#allocation8]  }
  0x28   :  { %vm202_vm1 = vmpackc.low %vm44_vm0, %vm44_vm0  ;;  %v49_v6 = vld [vmem:[#allocation3] sm:$0xff]  ;;  %v207_v7 = vpack.c.bf16 %v54_v5, %v53_v3  ;;  %v50_v8 = vld [vmem:[#allocation3 + $0x8] sm:$0xff]  ;;  %s165_s6 = sshll.u32 %s296_s1, 4  ;;  %s166_s6 = int_to_ptr.vmem [resolvable:$true] %s165_s6 }
  0x29   :  { %198 = vmatprep.mubr.msk.f32.mxu0 %vm44_vm0, %v49_v6  ;;  %203 = vmatprep.subr.msk.bf16.mxu0 %vm202_vm1, %v201_v4  ;;  %s263_s7 = scalar_lea.vmem %s166_s6, 256  ;;  %p268_p3 = scmp.lt.s32.totalorder %s166_s6, %s166_s6 }
  0x2a   :  { %206 = vmatpush3.bf16.xpose.msk.msra.mxu0 %vm202_vm1, %v201_v4  ;;  %p264_p2 = scmp.ne.s32.totalorder %s166_s6, %s263_s7  ;;  %p269_p4 = scmp.lt.s32.totalorder %s263_s7, %s263_s7 }
  0x2b   :  { %209 = vmatprep.subr.msk.bf16.mxu0 %vm202_vm1, %v207_v7 }
  0x2c   :  { %p270_p5 = por %p269_p4, %p268_p3 }
  0x2e   :  { %v48_v9 = vld [vmem:[#allocation2 + $0x8] sm:$0xff]  ;;  %v47_v10 = vld [vmem:[#allocation2] sm:$0xff]  ;;  %p271_p6 = pnand %p270_p5, %p264_p2 }
  0x32   :  { %212 = vmatpush3.bf16.xpose.msk.msra.mxu0 %vm202_vm1, %v207_v7 }
  0x39   :  { %199 = vmatmul.mubr.msk.f32.vlgmr.msra.gmra.mrb[0].mxu0 %vm44_vm0, %v50_v8 }
 0x10c   :  { %v200_v11 = vpop.f32.mrb[0].mxu0 }
 0x10d   :  { %v150_v12 = vadd.f32 %v200_v11, %v48_v9  ;;  %v140_v13 = vpop.f32.mrb[1].mxu0 }
 0x10e   :  { %v149_v14 = vadd.f32 %v140_v13, %v47_v10 }
 0x10f   :  { %152 = vst.msk [vmem:[#allocation2 + $0x8] sm:$0xff] %vm44_vm0, %v150_v12 }
 0x110   :  { %151 = vst.msk [vmem:[#allocation2] sm:$0xff] %vm44_vm0, %v149_v14 }
 0x116   :  { %v157_v15 = vld [vmem:[#allocation2 + $0x8] sm:$0xff] }
 0x117   :  { %v156_v16 = vld [vmem:[#allocation2] sm:$0xff]  ;;  %159 = vst.msk [vmem:[#allocation8 + $0x8] sm:$0xff] %vm44_vm0, %v157_v15 }
 0x118   :  { %158 = vst.msk [vmem:[#allocation8] sm:$0xff] %vm44_vm0, %v156_v16 }
 0x119   :  { %274 = shalt.err (!%p271_p6)
}
 0x11a   :  { %s275_s10 = scalar_lea.hbm %s369_s2, 256 }
 0x11b   :  { %p276_p7 = scmp.ne.s32.totalorder %s369_s2, %s275_s10  ;;  %p279_p8 = scmp.lt.u32.totalorder %s275_s10, %s369_s2 }
 0x11d   :  { %p281_p9 = pnand %p279_p8, %p276_p7 }
 0x11f   :  { %284 = shalt.err (!%p281_p9)
}
 0x120   :  { %171 = dma.vmem_to_hbm [thread:$0]  %s166_s6, 256, %s369_s2, [#allocation5], %s292_s19, %s292_s19, %s293_s20  }
 0x121   :  { %289 = dma.done.wait [#allocation5], 256  }
 0x122   :  { %290 = vsyncadd [#allocation5], 4294967040 }
 0x123   :  { %175 = vsyncpa [#allocation4], 1 }
 0x124   :  { %176 = vsyncpa [#allocation7], 1 }
 0x125   :  { %177 = vsyncpa [#allocation5], 1 }

</bundles_post_ra>
